<compile_context>
chip_gen: v5e
topology: v5e:2x2
jax: 0.10.0
libtpu: 0.0.40
codegen_flags: <defaults>
</compile_context>

<pallas_src>
import functools

import jax
import jax.numpy as jnp
from jax.experimental import pallas as pl
from jax.experimental.pallas import tpu as pltpu


def _fpn_cosine_kernel(x_ref, cls_wt_ref, bbox_wt_ref, bbox_b_ref,
                       scores_ref, bbox_ref):
    x = x_ref[...]                                      # (TILE_N, C) f32

    # ---- bbox branch: Linear(relu(x)) with bias (weights pre-transposed) ----
    relu_x = jnp.maximum(x, 0.0).astype(bbox_wt_ref.dtype)
    bbox = jnp.dot(relu_x, bbox_wt_ref[...],
                   preferred_element_type=jnp.float32)
    bbox_ref[...] = (bbox + bbox_b_ref[...]).astype(bbox_ref.dtype)

    # ---- cosine classification branch ----
    # 1/max(||x||, 1e-12) == rsqrt(max(||x||^2, 1e-24)); rsqrt runs on the EUP.
    sumsq = jnp.sum(x * x, axis=-1, keepdims=True)
    inv_norm = jax.lax.rsqrt(jnp.maximum(sumsq, jnp.float32(1e-24)))
    x_n = (x * inv_norm).astype(cls_wt_ref.dtype)
    # cls weight already L2-normalized, transposed and scaled by scale_cls.
    scores_ref[...] = jnp.dot(x_n, cls_wt_ref[...],
                              preferred_element_type=jnp.float32
                              ).astype(scores_ref.dtype)


def _round_up(v, m):
    return (v + m - 1) // m * m


@functools.partial(jax.jit, static_argnames=("compute_dtype", "tile_n"))
def fpn_cosine_predictor(x, cls_weight, bbox_weight, bbox_bias, scale_cls,
                         *, compute_dtype=jnp.bfloat16, tile_n=256):
    """JAX/Pallas equivalent of FPNCosinePredictor.forward.

    x:           (N, C) or (N, C, 1, 1) float32
    cls_weight:  (num_classes, C) float32            (no bias)
    bbox_weight: (num_bbox_reg_classes*4, C) float32
    bbox_bias:   (num_bbox_reg_classes*4,) float32
    scale_cls:   scalar
    compute_dtype: dtype for the MXU matmul operands (bf16 default; the
                   normalization and accumulation stay in f32).
    returns:     (scores, bbox_deltas)
    """
    if x.ndim == 4:
        assert x.shape[2] == 1 and x.shape[3] == 1
        x = x.reshape(x.shape[0], -1)
    x = x.astype(jnp.float32)

    n, c = x.shape
    num_classes = cls_weight.shape[0]
    bbox_dim = bbox_weight.shape[0]
    eps = jnp.float32(1e-12)
    scale = jnp.asarray(scale_cls, dtype=jnp.float32)

    # --- wrapper-side weight prep (trace-time / XLA-fused, off the hot path) ---
    # Pre-normalize cls weight and fold scale_cls into it.
    cls_w = cls_weight.astype(jnp.float32)
    w_norm = jnp.sqrt(jnp.sum(cls_w * cls_w, axis=-1, keepdims=True))
    cls_wn = scale * cls_w / jnp.maximum(w_norm, eps)    # (num_classes, C)

    lane = 128
    nc_pad = _round_up(num_classes, lane)
    nb_pad = _round_up(bbox_dim, lane)

    # Pre-transpose to (C, out) and lane-pad the output dims with zeros.
    cls_wt = jnp.zeros((c, nc_pad), jnp.float32).at[:, :num_classes].set(cls_wn.T)
    bbox_wt = jnp.zeros((c, nb_pad), jnp.float32).at[:, :bbox_dim].set(
        bbox_weight.astype(jnp.float32).T)
    bbox_b = jnp.zeros((1, nb_pad), jnp.float32).at[:, :bbox_dim].set(
        bbox_bias.astype(jnp.float32))

    cls_wt = cls_wt.astype(compute_dtype)
    bbox_wt = bbox_wt.astype(compute_dtype)

    # --- tile over N (sublane-aligned), pad rows with zeros ---
    tn = min(int(tile_n), _round_up(n, 8))
    n_pad = _round_up(n, tn)
    if n_pad != n:
        x = jnp.pad(x, ((0, n_pad - n), (0, 0)))
    grid = (n_pad // tn,)

    scores_p, bbox_p = pl.pallas_call(
        _fpn_cosine_kernel,
        out_shape=(
            jax.ShapeDtypeStruct((n_pad, nc_pad), jnp.float32),
            jax.ShapeDtypeStruct((n_pad, nb_pad), jnp.float32),
        ),
        grid_spec=pltpu.PrefetchScalarGridSpec(
            num_scalar_prefetch=0,
            grid=grid,
            in_specs=[
                pl.BlockSpec((tn, c), lambda i: (i, 0)),        # x tile
                pl.BlockSpec((c, nc_pad), lambda i: (0, 0)),    # cls weight^T
                pl.BlockSpec((c, nb_pad), lambda i: (0, 0)),    # bbox weight^T
                pl.BlockSpec((1, nb_pad), lambda i: (0, 0)),    # bbox bias
            ],
            out_specs=(
                pl.BlockSpec((tn, nc_pad), lambda i: (i, 0)),
                pl.BlockSpec((tn, nb_pad), lambda i: (i, 0)),
            ),
        ),
        compiler_params=pltpu.CompilerParams(
            dimension_semantics=("parallel",)),
    )(x, cls_wt, bbox_wt, bbox_b)

    return scores_p[:n, :num_classes], bbox_p[:n, :bbox_dim]


def _reference(x, cls_weight, bbox_weight, bbox_bias, scale_cls):
    if x.ndim == 4:
        x = x.reshape(x.shape[0], -1)
    relu_x = jnp.maximum(x, 0.0)
    bbox = relu_x @ bbox_weight.T + bbox_bias
    eps = 1e-12
    xn = x / jnp.maximum(jnp.linalg.norm(x, axis=-1, keepdims=True), eps)
    wn = cls_weight / jnp.maximum(
        jnp.linalg.norm(cls_weight, axis=-1, keepdims=True), eps)
    scores = scale_cls * (xn @ wn.T)
    return scores, bbox


if __name__ == "__main__":
    # Small config consistent with the module:
    #   representation_size = in_channels = 32
    #   num_classes = 8  (cfg.MODEL.ROI_BOX_HEAD.NUM_CLASSES)
    #   CLS_AGNOSTIC_BBOX_REG = False -> num_bbox_reg_classes = num_classes
    #   cfg.MODEL.FEW_SHOT.ScaleCls = 20.0
    N, C = 8, 32
    NUM_CLASSES = 8
    BBOX_DIM = NUM_CLASSES * 4
    SCALE_CLS = 20.0

    key = jax.random.PRNGKey(0)
    k_x, k_cls, k_bbox = jax.random.split(key, 3)

    # ROI-pooled features arrive as (N, C, 1, 1)
    x = jax.random.normal(k_x, (N, C, 1, 1), dtype=jnp.float32)

    # Deterministic parameter init mirroring nn.init in __init__:
    cls_weight = 0.01 * jax.random.normal(k_cls, (NUM_CLASSES, C),
                                          dtype=jnp.float32)
    bbox_weight = 0.001 * jax.random.normal(k_bbox, (BBOX_DIM, C),
                                            dtype=jnp.float32)
    bbox_bias = jnp.zeros((BBOX_DIM,), dtype=jnp.float32)

    ref_scores, ref_bbox = _reference(
        x, cls_weight, bbox_weight, bbox_bias, SCALE_CLS)

    # 1) Exact-precision path (f32 matmul operands) — tight tolerance.
    scores32, bbox32 = fpn_cosine_predictor(
        x, cls_weight, bbox_weight, bbox_bias, SCALE_CLS,
        compute_dtype=jnp.float32)
    jax.block_until_ready((scores32, bbox32))
    assert scores32.shape == (N, NUM_CLASSES)
    assert bbox32.shape == (N, BBOX_DIM)
    assert jnp.allclose(scores32, ref_scores, atol=1e-5, rtol=1e-5)
    assert jnp.allclose(bbox32, ref_bbox, atol=1e-5, rtol=1e-5)

    # 2) Default fast path (bf16 matmul operands, f32 accumulate) — relaxed
    #    tolerance appropriate for bf16 mantissa with scale_cls = 20.
    scores_bf, bbox_bf = fpn_cosine_predictor(
        x, cls_weight, bbox_weight, bbox_bias, SCALE_CLS)
    jax.block_until_ready((scores_bf, bbox_bf))
    assert scores_bf.shape == (N, NUM_CLASSES)
    assert bbox_bf.shape == (N, BBOX_DIM)
    assert jnp.allclose(scores_bf, ref_scores, atol=1e-1, rtol=5e-2)
    assert jnp.allclose(bbox_bf, ref_bbox, atol=1e-3, rtol=5e-2)

    print("KERNEL_OK")
</pallas_src>

<mosaic_0001>
module attributes {stable_mosaic.version = 11 : i64} {
  func.func @_fpn_cosine_kernel(%arg0: i32, %arg1: memref<8x32xf32, #tpu.memory_space<vmem>>, %arg2: memref<32x128xf32, #tpu.memory_space<vmem>>, %arg3: memref<32x128xf32, #tpu.memory_space<vmem>>, %arg4: memref<1x128xf32, #tpu.memory_space<vmem>>, %arg5: memref<8x128xf32, #tpu.memory_space<vmem>>, %arg6: memref<8x128xf32, #tpu.memory_space<vmem>>) attributes {dimension_semantics = [#tpu.dimension_semantics<parallel>], iteration_bounds = array<i64: 1>, scalar_prefetch = 0 : i64, scratch_operands = 0 : i64, tpu.core_type = #tpu.core_type<tc>, window_params = [{transform_indices = @transform_0, window_bounds = array<i64: 8, 32>}, {pipeline_mode = #tpu.pipeline_mode<synchronous>, transform_indices = @transform_1, window_bounds = array<i64: 32, 128>}, {pipeline_mode = #tpu.pipeline_mode<synchronous>, transform_indices = @transform_2, window_bounds = array<i64: 32, 128>}, {pipeline_mode = #tpu.pipeline_mode<synchronous>, transform_indices = @transform_3, window_bounds = array<i64: 1, 128>}, {transform_indices = @transform_4, window_bounds = array<i64: 8, 128>}, {transform_indices = @transform_5, window_bounds = array<i64: 8, 128>}]} {
    %c0 = arith.constant 0 : index
    %c0_0 = arith.constant 0 : index
    %0 = vector.load %arg1[%c0, %c0_0] : memref<8x32xf32, #tpu.memory_space<vmem>>, vector<8x32xf32>
    %cst = arith.constant 0.000000e+00 : f32
    %1 = vector.broadcast %cst : f32 to vector<8x32xf32>
    %2 = arith.maximumf %0, %1 : vector<8x32xf32>
    %c0_1 = arith.constant 0 : index
    %c0_2 = arith.constant 0 : index
    %3 = vector.load %arg3[%c0_1, %c0_2] : memref<32x128xf32, #tpu.memory_space<vmem>>, vector<32x128xf32>
    %cst_3 = arith.constant dense<0.000000e+00> : vector<8x128xf32>
    %4 = tpu.matmul %2, %3, %cst_3 {dimension_numbers = #tpu.dot_dimension_numbers<[1], [0], [0], [1], [0, 0, 1, 1], [], []>} : vector<8x32xf32>, vector<32x128xf32>, vector<8x128xf32> -> vector<8x128xf32>
    %c0_4 = arith.constant 0 : index
    %c0_5 = arith.constant 0 : index
    %5 = vector.load %arg4[%c0_4, %c0_5] : memref<1x128xf32, #tpu.memory_space<vmem>>, vector<1x128xf32>
    %6 = vector.broadcast %5 : vector<1x128xf32> to vector<8x128xf32>
    %7 = arith.addf %4, %6 : vector<8x128xf32>
    %c0_6 = arith.constant 0 : index
    %c0_7 = arith.constant 0 : index
    %8 = vector.load %arg6[%c0_6, %c0_7] : memref<8x128xf32, #tpu.memory_space<vmem>>, vector<8x128xf32>
    tpu.vector_store %arg6[%c0_6, %c0_7], %7 {strides = array<i32>} : memref<8x128xf32, #tpu.memory_space<vmem>>, vector<8x128xf32>,
    %9 = arith.mulf %0, %0 : vector<8x32xf32>
    %cst_8 = arith.constant dense<0.000000e+00> : vector<8xf32>
    %10 = vector.multi_reduction <add>, %9, %cst_8 [1] : vector<8x32xf32> to vector<8xf32>
    %11 = vector.shape_cast %10 : vector<8xf32> to vector<8x1xf32>
    %cst_9 = arith.constant 1.000000e-24 : f32
    %12 = vector.broadcast %cst_9 : f32 to vector<8x1xf32>
    %13 = arith.maximumf %11, %12 : vector<8x1xf32>
    %14 = math.rsqrt %13 : vector<8x1xf32>
    %15 = vector.broadcast %14 : vector<8x1xf32> to vector<8x32xf32>
    %16 = arith.mulf %0, %15 : vector<8x32xf32>
    %c0_10 = arith.constant 0 : index
    %c0_11 = arith.constant 0 : index
    %17 = vector.load %arg2[%c0_10, %c0_11] : memref<32x128xf32, #tpu.memory_space<vmem>>, vector<32x128xf32>
    %cst_12 = arith.constant dense<0.000000e+00> : vector<8x128xf32>
    %18 = tpu.matmul %16, %17, %cst_12 {dimension_numbers = #tpu.dot_dimension_numbers<[1], [0], [0], [1], [0, 0, 1, 1], [], []>} : vector<8x32xf32>, vector<32x128xf32>, vector<8x128xf32> -> vector<8x128xf32>
    %c0_13 = arith.constant 0 : index
    %c0_14 = arith.constant 0 : index
    %19 = vector.load %arg5[%c0_13, %c0_14] : memref<8x128xf32, #tpu.memory_space<vmem>>, vector<8x128xf32>
    tpu.vector_store %arg5[%c0_13, %c0_14], %18 {strides = array<i32>} : memref<8x128xf32, #tpu.memory_space<vmem>>, vector<8x128xf32>,
    return
  }
  func.func @transform_0(%arg0: i32) -> (i32, i32) {
    %c0_i32 = arith.constant 0 : i32
    %c0_i32_0 = arith.constant 0 : i32
    return %arg0, %c0_i32 : i32, i32
  }
  func.func @transform_1(%arg0: i32) -> (i32, i32) {
    %c0_i32 = arith.constant 0 : i32
    %c0_i32_0 = arith.constant 0 : i32
    %c0_i32_1 = arith.constant 0 : i32
    return %c0_i32, %c0_i32_0 : i32, i32
  }
  func.func @transform_2(%arg0: i32) -> (i32, i32) {
    %c0_i32 = arith.constant 0 : i32
    %c0_i32_0 = arith.constant 0 : i32
    %c0_i32_1 = arith.constant 0 : i32
    return %c0_i32, %c0_i32_0 : i32, i32
  }
  func.func @transform_3(%arg0: i32) -> (i32, i32) {
    %c0_i32 = arith.constant 0 : i32
    %c0_i32_0 = arith.constant 0 : i32
    %c0_i32_1 = arith.constant 0 : i32
    return %c0_i32, %c0_i32_0 : i32, i32
  }
  func.func @transform_4(%arg0: i32) -> (i32, i32) {
    %c0_i32 = arith.constant 0 : i32
    %c0_i32_0 = arith.constant 0 : i32
    return %arg0, %c0_i32 : i32, i32
  }
  func.func @transform_5(%arg0: i32) -> (i32, i32) {
    %c0_i32 = arith.constant 0 : i32
    %c0_i32_0 = arith.constant 0 : i32
    return %arg0, %c0_i32 : i32, i32
  }
}

</mosaic_0001>

<bundles_post_ra>
// kernel: fpn_cosine_predictor.1
= control target key start
LH: loop header
LB: loop body
LE: loop exit
PB: predicated region body
PF: predicated region fallthrough
CT: control target
= control target key end

     0   :  { %11 = vsyncpa [#allocation3], 0  ;;  %vm31_vm0 = vcmask 261120   ;;  %s262_s0 = inlined_call_operand.vmem [shape: f32[8,32], index: 0, kind: input, shape index: {}]   ;;  %s263_s1 = inlined_call_operand.vmem [shape: f32[32,128], index: 1, kind: input, shape index: {}]   ;;  %s264_s2 = inlined_call_operand.vmem [shape: f32[32,128], index: 2, kind: input, shape index: {}]   ;;  %s265_s3 = inlined_call_operand.vmem [shape: f32[1,128], index: 3, kind: input, shape index: {}]   ;;  %s266_s4 = inlined_call_operand.hbm [shape: f32[8,128], index: 4, kind: output, shape index: {0}]   ;;  %s267_s5 = inlined_call_operand.hbm [shape: f32[8,128], index: 5, kind: output, shape index: {1}]  }
   0x1   :  { %v21_v0 = vld [vmem:[%s262_s0] sm:$0xff] }
   0x2   :  { %12 = vsyncpa [#allocation5], 0  ;;  %v56_v1 = vmul.f32 %v21_v0, %v21_v0  ;;  %v26_v3 = vld [vmem:[%s264_s2 + $0x18] sm:$0xff]  ;;  %v25_v4 = vld [vmem:[%s264_s2 + $0x10] sm:$0xff]  ;;  %v22_v10 = vmax.f32 %v21_v0, 0.0  ;;  %s191_s10 = smov [#allocation4]  }
   0x3   :  { %47 = vmatpush.msra.mxu0 %v26_v3  ;;  %v75_v5 = vld [vmem:[%s263_s1 + $0x18] sm:$0xff]  ;;  %v24_v6 = vld [vmem:[%s264_s2 + $0x8] sm:$0xff]  ;;  %v74_v7 = vld [vmem:[%s263_s1 + $0x10] sm:$0xff]  ;;  %s116_s11 = sshll.u32 %s191_s10, 4  ;;  %s118_s14 = sshll.u32 %s267_s5, 4  ;;  %s117_s11 = int_to_ptr.vmem [resolvable:$true] %s116_s11  ;;  %s119_s14 = int_to_ptr.hbm [resolvable:$true] %s118_s14 }
   0x4   :  { %v57_v2 = vsel %vm31_vm0, %v56_v1, 0.0  ;;  %91 = vmatpush.msra.mxu1 %v75_v5  ;;  %v23_v8 = vld [vmem:[%s264_s2] sm:$0xff]  ;;  %v73_v9 = vld [vmem:[%s263_s1 + $0x8] sm:$0xff]  ;;  %s192_s15 = smov [#allocation2]   ;;  %s107_s19 = sshll.u32 %s266_s4, 4  ;;  %s108_s19 = int_to_ptr.hbm [resolvable:$true] %s107_s19 }
   0x5   :  { %58 = vadd.xlane.f32.xlu0 %v57_v2  ;;  %48 = vmatpush.msra.mxu0 %v25_v4  ;;  %v72_v11 = vld [vmem:[%s263_s1] sm:$0xff]  ;;  %s105_s16 = sshll.u32 %s192_s15, 4  ;;  %s106_s16 = int_to_ptr.vmem [resolvable:$true] %s105_s16 }
   0x6   :  { %92 = vmatpush.msra.mxu1 %v74_v7  ;;  %v136_v22 = vld [vmem:[%s265_s3] ss:$0 sm:$0xff] }
   0x7   :  { %49 = vmatpush.msra.mxu0 %v24_v6 }
   0x8   :  { %93 = vmatpush.msra.mxu1 %v73_v9 }
   0x9   :  { %50 = vmatpush.msra.mxu0 %v23_v8 }
   0xa   :  { %132 = vmatmul.msk.f32.vlgmr.msra.gmra.mxu0 %vm31_vm0, %v22_v10  ;;  %94 = vmatpush.msra.mxu1 %v72_v11 }
  0x78   :  { %v59_v12 = vpop.xlane.xlu0 %58 }
  0x79   :  { %v60_v13 = vmax.f32 %v59_v12, 1e-24 }
  0x7b   :  { %137 = vrsqrt.f32 %v60_v13  ;;  %vm67_vm2 = vweird.f32 %v60_v13 }
  0x81   :  { %v138_v14 = vpop.eup %137 }
  0x82   :  { %v62_v15 = vmul.f32 %v138_v14, %v60_v13  ;;  %vm68_vm1 = vweird.f32 %v138_v14 }
  0x83   :  { %vm69_vm3 = vmor %vm67_vm2, %vm68_vm1 }
  0x84   :  { %v63_v16 = vmul.f32 %v138_v14, %v62_v15 }
  0x86   :  { %v64_v17 = vmul.f32 0.5, %v63_v16 }
  0x87   :  { %v52_v23 = vpop.f32.mrf.mxu0 }
  0x88   :  { %v65_v18 = vsub.f32 1.5, %v64_v17  ;;  %v53_v24 = vadd.f32 %v136_v22, %v52_v23 }
  0x8a   :  { %v66_v19 = vmul.f32 %v138_v14, %v65_v18  ;;  %55 = vst [vmem:[#allocation4] sm:$0xff] %v53_v24 }
  0x8b   :  { %121 = dma.vmem_to_hbm [thread:$0]  %s117_s11, 128, %s119_s14, [#allocation5]  }
  0x8c   :  { %v70_v20 = vsel %vm69_vm3, %v138_v14, %v66_v19 }
  0x8d   :  { %v71_v21 = vmul.f32 %v70_v20, %v21_v0 }
  0x8f   :  { %133 = vmatmul.msk.f32.vlgmr.msra.gmra.mxu1 %vm31_vm0, %v71_v21 }
 0x10c   :  { %v96_v25 = vpop.f32.mrf.mxu1 }
 0x10d   :  { %99 = vst [vmem:[#allocation2] sm:$0xff] %v96_v25 }
 0x10e   :  { %110 = dma.vmem_to_hbm [thread:$0]  %s106_s16, 128, %s108_s19, [#allocation3]  }
 0x10f   :  { %187 = dma.done.wait [#allocation3], 128  }
 0x110   :  { %188 = vsyncadd [#allocation3], 4294967168 }
 0x111   :  { %189 = dma.done.wait [#allocation5], 128  }
 0x112   :  { %190 = vsyncadd [#allocation5], 4294967168 }
 0x113   :  { %130 = vsyncpa [#allocation3], 1 }
 0x114   :  { %131 = vsyncpa [#allocation5], 1 }

</bundles_post_ra>
